<compile_context>
chip_gen: v5e
topology: v5e:2x2
jax: 0.10.0
libtpu: 0.0.40
codegen_flags: <defaults>
</compile_context>

<pallas_src>
import functools

import numpy as np
import jax
import jax.numpy as jnp
from jax import lax
from jax.experimental import pallas as pl
from jax.experimental.pallas import tpu as pltpu

F32 = jnp.float32
VMEM = pltpu.MemorySpace.VMEM
SMEM = pltpu.MemorySpace.SMEM

# Data-path matmul dtype.  Set to jnp.bfloat16 on v6e/v7x for ~2x MXU throughput;
# kept f32 here so the in-script reference check stays tight.
MM_DTYPE = jnp.float32


def _full_vmem():
    return pl.BlockSpec(memory_space=VMEM)


def _full_smem():
    return pl.BlockSpec(memory_space=SMEM)


# --------------------------------------------------------------------------------------
# Kernel 0: graph stage (gridless; N x N work is small and inherently global).
#   - S = column-normalized softmax(relu(E E^T) with stay_cost diagonal)
#   - supports applied iteratively: xs_k = S @ xs_{k-1}
#   - supra-Laplacian window term collapsed to S^T @ (frame sum) + jump_cost * wsum
#   - node-adaptive bias (the only remaining standalone embed-dim matmul)
# --------------------------------------------------------------------------------------
def _graph_kernel(*refs, fixed_adj, link_len, n_boot):
    if fixed_adj:
        (adj_ref, emb_ref, x_ref, xwsum_ref, xwwsum_ref, bpool_ref, scal_ref,
         xs_out, xws_out, bias_out) = refs
    else:
        (emb_ref, x_ref, xwsum_ref, xwwsum_ref, bpool_ref, scal_ref,
         xs_out, xws_out, bias_out) = refs

    emb = emb_ref[...]                                           # (N, D)
    n = emb.shape[0]

    # ---- S construction: exact f32 (feeds S powers and every downstream matmul)
    s0 = lax.dot_general(emb, emb, (((1,), (1,)), ((), ())),
                         preferred_element_type=F32)             # E @ E^T  (N, N)
    s0 = jnp.maximum(s0, 0.0)
    rows = lax.broadcasted_iota(jnp.int32, (n, n), 0)
    cols = lax.broadcasted_iota(jnp.int32, (n, n), 1)
    s0 = jnp.where(rows == cols, scal_ref[0], s0)                # diagonal = stay_cost
    if fixed_adj:
        # Faithful to torch: exp of an unbounded relu score, kept f32.
        S = adj_ref[...] * jnp.exp(s0)
    else:
        m = jnp.max(s0, axis=1, keepdims=True)
        e = jnp.exp(s0 - m)
        S = e / jnp.sum(e, axis=1, keepdims=True)                # exact division
    # torch quirk: S / S.sum(dim=1) broadcasts over the LAST axis (col j / rowsum[j]).
    S = S / jnp.sum(S, axis=1)[None, :]

    # ---- spatial supports applied iteratively (S powers never materialized)
    cur = x_ref[...]                                             # (N, B*Cin)
    for k in range(1, link_len):
        cur = jnp.dot(S.astype(MM_DTYPE), cur.astype(MM_DTYPE),
                      preferred_element_type=F32)
        xs_out[k - 1] = cur

    # ---- supra term: the (nb*N)^2 block matrix collapses after the frame mean
    xws = lax.dot_general(S, xwsum_ref[...], (((0,), (0,)), ((), ())),
                          preferred_element_type=F32)            # S^T @ xw_sum (N, B*I)
    xws_out[...] = (xws + scal_ref[1] * xwwsum_ref[...]) * (1.0 / n_boot)

    # ---- node-adaptive bias
    bias_out[...] = jnp.dot(emb, bpool_ref[...], preferred_element_type=F32)


# --------------------------------------------------------------------------------------
# Kernel 1: topo CNN -- ONE im2col matmul for every batch element, ReLU, global pools.
# --------------------------------------------------------------------------------------
def _topo_cnn_kernel(patches_ref, w_ref, b_ref, out_ref, *, batch, o8):
    y = jnp.dot(patches_ref[...].astype(MM_DTYPE), w_ref[...].astype(MM_DTYPE),
                preferred_element_type=F32) + b_ref[...]         # (B*P, 2*O8)
    y = jnp.maximum(y, 0.0)
    y3 = y.reshape(batch, -1, y.shape[-1])                       # (B, P, 2*O8)
    mean_part = jnp.mean(y3[:, :, :o8], axis=1)                  # (B, O8)  mean-pool conv
    max_part = jnp.max(y3[:, :, o8:], axis=1)                    # (B, O8)  max-pool conv
    out_ref[...] = jnp.concatenate([mean_part, max_part], axis=1)


# --------------------------------------------------------------------------------------
# Kernel 2: per-(node, batch) weight-pool contraction -- gridded over batch blocks.
#   feat   (bblk, N, Call)   concatenated conv inputs  [x | S^k x | supra | temporal]
#   tscale (bblk, 1, dim_out) = [1..1 | topo_cnn | 1..1]
#   p2     (Call, embed_dim*dim_out)  block-structured weight pool (built in glue)
# --------------------------------------------------------------------------------------
def _contract_kernel(feat_ref, tscale_ref, emb_ref, p2_ref, bias_ref, out_ref, *,
                     dim_out, embed_dim):
    bblk, n, call = feat_ref.shape
    feat2 = feat_ref[...].reshape(bblk * n, call)                # leading-dim merge only
    # One MXU pass: contraction over the conv-feature axis; output fans out over
    # (embed_dim, dim_out), which is lane-dense for realistic sizes.
    h = jnp.dot(feat2.astype(MM_DTYPE), p2_ref[...].astype(MM_DTYPE),
                preferred_element_type=F32)                      # (bblk*N, D*dim_out)
    h3 = h.reshape(bblk, n, embed_dim * dim_out)
    emb = emb_ref[...]                                           # (N, D)
    acc = jnp.zeros((bblk, n, dim_out), F32)
    for d in range(embed_dim):                                   # short static unroll
        acc = acc + emb[None, :, d:d + 1] * h3[:, :, d * dim_out:(d + 1) * dim_out]
    # topo scaling of the supra slab (tscale is 1 elsewhere), then node-adaptive bias;
    # single lane-dense store, no in-kernel concat of branch results.
    out_ref[...] = acc * tscale_ref[...] + bias_ref[...][None, :, :]


# --------------------------------------------------------------------------------------
# Glue
# --------------------------------------------------------------------------------------
def _im2col_3x3(x_nchw):
    # TODO(synk): move im2col in-kernel (padded VMEM tile + 9 shifted static slices) to
    # avoid the 9x HBM expansion on bandwidth-limited chips (v5e).
    B, C, H, W = x_nchw.shape
    xp = jnp.pad(x_nchw, ((0, 0), (0, 0), (1, 1), (1, 1)))
    cols = []
    for c in range(C):
        for dy in range(3):
            for dx in range(3):
                cols.append(xp[:, c, dy:dy + H, dx:dx + W])      # (B, H, W)
    patches = jnp.stack(cols, axis=-1)                           # (B, H, W, C*9)
    return patches.reshape(B * H * W, C * 9)


def _pick_batch_block(batch):
    for d in (8, 4, 2):
        if batch % d == 0 and batch // d >= 2:
            return d
    return 1


class TAMPSTGCNCNNPallas:
    def __init__(self, dim_in, dim_out, window_len, link_len, embed_dim, key):
        assert link_len >= 2, "torch module implicitly requires link_len >= 2"
        assert dim_out % 8 == 0
        self.dim_in, self.dim_out = dim_in, dim_out
        self.window_len, self.link_len, self.embed_dim = window_len, link_len, embed_dim
        self.o4, self.o2, self.o8 = dim_out // 4, dim_out // 2, dim_out // 8
        wdim = 1 if (dim_in - 1) % 16 == 0 else dim_in // 2
        self.wdim = wdim
        ks = jax.random.split(key, 9)
        init = lambda k, s: (0.1 * jax.random.normal(k, s)).astype(F32)
        self.weights_pool = init(ks[0], (embed_dim, link_len, dim_in, self.o4))
        self.window_weights_supra = init(ks[1], (embed_dim, wdim, self.o4))
        self.window_weights_temporal = init(ks[2], (embed_dim, wdim, self.o2))
        self.bias_pool = init(ks[3], (embed_dim, dim_out))
        self.T = init(ks[4], (window_len,))
        # TODO(synk): MEANCNN/MAXCNN are not defined in the provided source; assumed
        # Conv2d(window_len, dim_out//8, kernel=3, pad=1) + ReLU + global mean/max pool.
        self.cnn_mean_w = init(ks[5], (self.o8, window_len, 3, 3))
        self.cnn_mean_b = init(ks[6], (self.o8,))
        self.cnn_max_w = init(ks[7], (self.o8, window_len, 3, 3))
        self.cnn_max_b = init(ks[8], (self.o8,))

    def __call__(self, x, x_window, node_embeddings, fixed_adj, adj,
                 stay_cost, jump_cost, MPG, bootstrap_idx):
        B, N, Cin = x.shape
        I = x_window.shape[3]
        assert I == self.wdim
        D, K = self.embed_dim, self.link_len
        dim_out, o4, o2, o8 = self.dim_out, self.o4, self.o2, self.o8
        nb = len(bootstrap_idx)
        boot = jnp.asarray(np.asarray(bootstrap_idx), dtype=jnp.int32)

        # ---- topo CNN: glue im2col + ONE (B*P, Kc) @ (Kc, 2*O8) MXU matmul -------------
        Bt, Cw = MPG.shape[0], MPG.shape[1]
        patches = _im2col_3x3(MPG)                               # (B*H*W, Cw*9)
        wcat = jnp.concatenate([self.cnn_mean_w.reshape(o8, -1).T,
                                self.cnn_max_w.reshape(o8, -1).T], axis=1)  # (Kc, 2*O8)
        bcat = jnp.concatenate([self.cnn_mean_b, self.cnn_max_b]).reshape(1, 2 * o8)
        topo = pl.pallas_call(
            functools.partial(_topo_cnn_kernel, batch=Bt, o8=o8),
            out_shape=jax.ShapeDtypeStruct((Bt, 2 * o8), F32),
            in_specs=[_full_vmem(), _full_vmem(), _full_vmem()],
            out_specs=_full_vmem(),
        )(patches, wcat, bcat)                                   # (B, O4)

        # ---- glue pre-reductions over frames (kernels never see (B,T,N,I)) -------------
        xwb = x_window[:, boot, :, :]                            # (B, nb, N, I)
        xw_sum = jnp.sum(xwb, axis=1)                            # (B, N, I)
        coef = jnp.asarray(nb - 1 - np.arange(nb), F32)          # upper-triangle jump count
        xw_wsum = jnp.einsum('f,bfni->bni', coef, xwb)           # (B, N, I)
        xw_T = jnp.einsum('t,btni->bni', self.T, x_window)       # (B, N, I)

        # node-major layouts (rows = nodes) for the S matmuls; columns are b-major.
        x_t = x.transpose(1, 0, 2).reshape(N, B * Cin)
        xw_sum_t = xw_sum.transpose(1, 0, 2).reshape(N, B * I)
        xw_wsum_t = xw_wsum.transpose(1, 0, 2).reshape(N, B * I)
        scal = jnp.asarray([stay_cost, jump_cost], F32)

        # ---- kernel 0: S + iterative supports + supra collapse + bias ------------------
        graph_in = [node_embeddings, x_t, xw_sum_t, xw_wsum_t, self.bias_pool, scal]
        graph_specs = [_full_vmem()] * 5 + [_full_smem()]
        if fixed_adj:                                            # adj only DMA'd if used
            graph_in = [adj] + graph_in
            graph_specs = [_full_vmem()] + graph_specs
        xs_pows, mean_xws, bias = pl.pallas_call(
            functools.partial(_graph_kernel, fixed_adj=bool(fixed_adj),
                              link_len=K, n_boot=nb),
            out_shape=(jax.ShapeDtypeStruct((K - 1, N, B * Cin), F32),
                       jax.ShapeDtypeStruct((N, B * I), F32),
                       jax.ShapeDtypeStruct((N, dim_out), F32)),
            in_specs=graph_specs,
            out_specs=(_full_vmem(), _full_vmem(), _full_vmem()),
        )(*graph_in)

        # ---- glue: batch-leading conv-feature slab + block-structured weight pool ------
        call = K * Cin + 2 * I
        xs_pows_b = xs_pows.reshape(K - 1, N, B, Cin).transpose(2, 1, 0, 3) \
                           .reshape(B, N, (K - 1) * Cin)
        mean_xws_b = mean_xws.reshape(N, B, I).transpose(1, 0, 2)
        feat_b = jnp.concatenate([x, xs_pows_b, mean_xws_b, xw_T], axis=-1)  # (B, N, Call)

        # P2[c, d*dim_out + o]: spatial / supra / temporal pools occupy disjoint output
        # column slabs -> the whole weight application is one matmul per batch block.
        p_full = jnp.zeros((call, D, dim_out), F32)
        p_full = p_full.at[:K * Cin, :, :o4].set(
            self.weights_pool.transpose(1, 2, 0, 3).reshape(K * Cin, D, o4))
        p_full = p_full.at[K * Cin:K * Cin + I, :, o4:2 * o4].set(
            self.window_weights_supra.transpose(1, 0, 2))
        p_full = p_full.at[K * Cin + I:, :, 2 * o4:].set(
            self.window_weights_temporal.transpose(1, 0, 2))
        p2 = p_full.reshape(call, D * dim_out)

        tscale = jnp.concatenate([jnp.ones((B, o4), F32), topo,
                                  jnp.ones((B, o2), F32)], axis=1)[:, None, :]

        # ---- kernel 2: gridded per-(node, batch) contraction ---------------------------
        bblk = _pick_batch_block(B)
        out = pl.pallas_call(
            functools.partial(_contract_kernel, dim_out=dim_out, embed_dim=D),
            grid=(B // bblk,),
            out_shape=jax.ShapeDtypeStruct((B, N, dim_out), F32),
            in_specs=[
                pl.BlockSpec((bblk, N, call), lambda b: (b, 0, 0)),
                pl.BlockSpec((bblk, 1, dim_out), lambda b: (b, 0, 0)),
                pl.BlockSpec((N, D), lambda b: (0, 0)),
                pl.BlockSpec((call, D * dim_out), lambda b: (0, 0)),
                pl.BlockSpec((N, dim_out), lambda b: (0, 0)),
            ],
            out_specs=pl.BlockSpec((bblk, N, dim_out), lambda b: (b, 0, 0)),
            compiler_params=pltpu.CompilerParams(dimension_semantics=("parallel",)),
        )(feat_b, tscale, node_embeddings, p2, bias)
        # TODO(synk): reference does torch.cat([x_sconv, 1, x_wconv_t], -1) (a literal 1,
        # a bug); the middle slot here uses x_twconv_s, the only tensor of that width.
        return out                                               # (B, N, dim_out)


# --------------------------------------------------------------------------------------
# Pure-JAX reference (mirrors the PyTorch forward, with the fixes noted above)
# --------------------------------------------------------------------------------------
def reference_forward(mod, x, x_window, emb, fixed_adj, adj, stay_cost, jump_cost, MPG, boot):
    N = emb.shape[0]
    B = x.shape[0]
    s0 = jnp.maximum(emb @ emb.T, 0.0)
    s0 = jnp.where(jnp.eye(N, dtype=bool), jnp.float32(stay_cost), s0)
    S = adj * jnp.exp(s0) if fixed_adj else jax.nn.softmax(s0, axis=1)
    S = S / jnp.sum(S, axis=1)                     # torch broadcasting over last axis
    sup = [jnp.eye(N, dtype=F32), S]
    for _ in range(2, mod.link_len):
        sup.append(S @ sup[-1])
    supports = jnp.stack(sup, 0)
    nb = len(boot)
    supra = jnp.zeros((nb * N, nb * N), F32)
    inter = jnp.float32(jump_cost) * jnp.eye(N, dtype=F32)
    for i in range(nb):
        for j in range(nb):
            if i == j:
                supra = supra.at[N * i:N * (i + 1), N * j:N * (j + 1)].set(S)
            elif j > i:
                supra = supra.at[N * i:N * (i + 1), N * j:N * (j + 1)].set(inter)
    weights = jnp.einsum('nd,dkio->nkio', emb, mod.weights_pool)
    bias = emb @ mod.bias_pool
    x_s = jnp.einsum('knm,bmc->bknc', supports, x).transpose(0, 2, 1, 3)
    x_sconv = jnp.einsum('bnki,nkio->bno', x_s, weights)
    w_s = jnp.einsum('nd,dio->nio', emb, mod.window_weights_supra)
    xwb = x_window[:, jnp.asarray(boot), :, :]
    _xw = xwb.reshape(B, -1, xwb.shape[-1])
    x_w_s = jnp.einsum('bmi,mn->bni', _xw, supra).reshape(B, nb, N, -1)
    x_wconv_s = jnp.einsum('bfni,nio->bfno', x_w_s, w_s).mean(axis=1)
    w_t = jnp.einsum('nd,dio->nio', emb, mod.window_weights_temporal)
    x_w_t = jnp.einsum('btni,nio->btno', x_window, w_t).transpose(0, 2, 3, 1)
    x_wconv_t = x_w_t @ mod.T

    def conv(inp, w, b):
        y = lax.conv_general_dilated(inp, w, (1, 1), 'SAME',
                                     dimension_numbers=('NCHW', 'OIHW', 'NCHW'))
        return jnp.maximum(y + b[None, :, None, None], 0.0)

    topo_mean = conv(MPG, mod.cnn_mean_w, mod.cnn_mean_b).mean(axis=(2, 3))
    topo_max = conv(MPG, mod.cnn_max_w, mod.cnn_max_b).max(axis=(2, 3))
    topo = jnp.concatenate([topo_mean, topo_max], axis=1)
    x_twconv_s = x_wconv_s * topo[:, None, :]
    return jnp.concatenate([x_sconv, x_twconv_s, x_wconv_t], axis=-1) + bias[None]


if __name__ == "__main__":
    key = jax.random.PRNGKey(0)
    B, N, dim_in, dim_out = 2, 8, 8, 16
    window_len, link_len, embed_dim = 8, 3, 4
    H = W = 16
    kx, kw, ke, ka, km, kp = jax.random.split(key, 6)
    x = jax.random.normal(kx, (B, N, dim_in), F32)
    x_window = jax.random.normal(kw, (B, window_len, N, dim_in // 2), F32)
    node_embeddings = jax.random.normal(ke, (N, embed_dim), F32)
    adj = jax.random.uniform(ka, (N, N), F32)
    MPG = jax.random.normal(km, (B, window_len, H, W), F32)
    stay_cost, jump_cost = 0.5, 0.3
    # torch draws Bootstrap_num randomly each forward; made a deterministic argument here.
    boot = np.sort(np.random.default_rng(0).choice(window_len, size=3))

    mod = TAMPSTGCNCNNPallas(dim_in, dim_out, window_len, link_len, embed_dim, kp)
    out = mod(x, x_window, node_embeddings, False, adj, stay_cost, jump_cost, MPG, boot)
    out = jax.block_until_ready(out)

    ref = jax.block_until_ready(
        reference_forward(mod, x, x_window, node_embeddings, False, adj,
                          stay_cost, jump_cost, MPG, boot))

    assert out.shape == (B, N, dim_out)
    assert bool(jnp.all(jnp.isfinite(out)))
    max_err = float(jnp.max(jnp.abs(out - ref)))
    # exact division in the S construction -> only matmul reorder noise remains
    assert max_err < 2e-3, f"max abs err vs reference: {max_err}"
    print("KERNEL_OK")
</pallas_src>

<mosaic_0001>
module attributes {stable_mosaic.version = 11 : i64} {
  func.func @_topo_cnn_kernel(%arg0: memref<512x72xf32, #tpu.memory_space<vmem>>, %arg1: memref<72x4xf32, #tpu.memory_space<vmem>>, %arg2: memref<1x4xf32, #tpu.memory_space<vmem>>, %arg3: memref<2x4xf32, #tpu.memory_space<vmem>>) attributes {dimension_semantics = [], scalar_prefetch = 0 : i64, scratch_operands = 0 : i64, tpu.core_type = #tpu.core_type<tc>} {
    %c0 = arith.constant 0 : index
    %c0_0 = arith.constant 0 : index
    %0 = vector.load %arg0[%c0, %c0_0] : memref<512x72xf32, #tpu.memory_space<vmem>>, vector<512x72xf32>
    %c0_1 = arith.constant 0 : index
    %c0_2 = arith.constant 0 : index
    %1 = vector.load %arg1[%c0_1, %c0_2] : memref<72x4xf32, #tpu.memory_space<vmem>>, vector<72x4xf32>
    %cst = arith.constant dense<0.000000e+00> : vector<512x4xf32>
    %2 = tpu.matmul %0, %1, %cst {dimension_numbers = #tpu.dot_dimension_numbers<[1], [0], [0], [1], [0, 0, 1, 1], [], []>} : vector<512x72xf32>, vector<72x4xf32>, vector<512x4xf32> -> vector<512x4xf32>
    %c0_3 = arith.constant 0 : index
    %c0_4 = arith.constant 0 : index
    %3 = vector.load %arg2[%c0_3, %c0_4] : memref<1x4xf32, #tpu.memory_space<vmem>>, vector<1x4xf32>
    %4 = vector.broadcast %3 : vector<1x4xf32> to vector<512x4xf32>
    %5 = arith.addf %2, %4 : vector<512x4xf32>
    %cst_5 = arith.constant 0.000000e+00 : f32
    %6 = vector.broadcast %cst_5 : f32 to vector<512x4xf32>
    %7 = arith.maximumf %5, %6 : vector<512x4xf32>
    %8 = vector.shape_cast %7 : vector<512x4xf32> to vector<2x256x4xf32>
    %9 = vector.extract_strided_slice %8 {offsets = [0, 0, 0], sizes = [2, 256, 2], strides = [1, 1, 1]} : vector<2x256x4xf32> to vector<2x256x2xf32>
    %cst_6 = arith.constant dense<0.000000e+00> : vector<2x2xf32>
    %10 = vector.multi_reduction <add>, %9, %cst_6 [1] : vector<2x256x2xf32> to vector<2x2xf32>
    %cst_7 = arith.constant 2.560000e+02 : f32
    %11 = vector.broadcast %cst_7 : f32 to vector<2x2xf32>
    %12 = arith.divf %10, %11 : vector<2x2xf32>
    %13 = vector.extract_strided_slice %8 {offsets = [0, 0, 2], sizes = [2, 256, 2], strides = [1, 1, 1]} : vector<2x256x4xf32> to vector<2x256x2xf32>
    %cst_8 = arith.constant dense<0xFF800000> : vector<2x2xf32>
    %14 = vector.multi_reduction <maximumf>, %13, %cst_8 [1] : vector<2x256x2xf32> to vector<2x2xf32>
    %15 = tpu.concatenate %12, %14 in 1 : vector<2x2xf32>, vector<2x2xf32> -> vector<2x4xf32>
    %c0_9 = arith.constant 0 : index
    %c0_10 = arith.constant 0 : index
    %16 = vector.load %arg3[%c0_9, %c0_10] : memref<2x4xf32, #tpu.memory_space<vmem>>, vector<2x4xf32>
    tpu.vector_store %arg3[%c0_9, %c0_10], %15 {strides = array<i32>} : memref<2x4xf32, #tpu.memory_space<vmem>>, vector<2x4xf32>,
    return
  }
}

</mosaic_0001>

<bundles_post_ra>
// kernel: tpu_custom_call.1
= control target key start
LH: loop header
LB: loop body
LE: loop exit
PB: predicated region body
PF: predicated region fallthrough
CT: control target
= control target key end

     0   :  { %s1814_s0 = inlined_call_operand.vmem [shape: f32[512,72], index: 0, kind: input, shape index: {}]   ;;  %s1815_s1 = inlined_call_operand.vmem [shape: f32[72,4], index: 1, kind: input, shape index: {}]   ;;  %s1816_s2 = inlined_call_operand.vmem [shape: f32[1,4], index: 2, kind: input, shape index: {}]   ;;  %s1817_s3 = inlined_call_operand.hbm [shape: f32[2,4], index: 3, kind: output, shape index: {}]  }
   0x1   :  { %v87_v0 = vld [vmem:[%s1815_s1 + $0x40] sm:$0xff]  ;;  %v86_v1 = vld [vmem:[%s1815_s1 + $0x38] sm:$0xff]  ;;  %v85_v2 = vld [vmem:[%s1815_s1 + $0x30] sm:$0xff] }
   0x2   :  { %292 = vmatpush.msra.mxu0 %v87_v0  ;;  %938 = vmatpush.msra.mxu2 %v87_v0  ;;  %v84_v3 = vld [vmem:[%s1815_s1 + $0x28] sm:$0xff]  ;;  %v83_v4 = vld [vmem:[%s1815_s1 + $0x20] sm:$0xff] }
   0x3   :  { %937 = vmatpush.msra.mxu1 %v87_v0  ;;  %939 = vmatpush.msra.mxu3 %v87_v0 }
   0x4   :  { %293 = vmatpush.msra.mxu0 %v86_v1  ;;  %941 = vmatpush.msra.mxu2 %v86_v1 }
   0x5   :  { %940 = vmatpush.msra.mxu1 %v86_v1  ;;  %942 = vmatpush.msra.mxu3 %v86_v1 }
   0x6   :  { %294 = vmatpush.msra.mxu0 %v85_v2  ;;  %944 = vmatpush.msra.mxu2 %v85_v2 }
   0x7   :  { %943 = vmatpush.msra.mxu1 %v85_v2  ;;  %945 = vmatpush.msra.mxu3 %v85_v2 }
   0x8   :  { %295 = vmatpush.msra.mxu0 %v84_v3  ;;  %947 = vmatpush.msra.mxu2 %v84_v3 }
   0x9   :  { %8 = vsyncpa [#allocation3], 0  ;;  %v82_v5 = vld [vmem:[%s1815_s1 + $0x18] sm:$0xff]  ;;  %946 = vmatpush.msra.mxu1 %v84_v3  ;;  %948 = vmatpush.msra.mxu3 %v84_v3  ;;  %v81_v6 = vld [vmem:[%s1815_s1 + $0x10] sm:$0xff]  ;;  %vm92_vm0 = vcmask 588800   ;;  %vm558_vm1 = vcmask 15360  }
   0xa   :  { %296 = vmatpush.msra.mxu0 %v83_v4  ;;  %950 = vmatpush.msra.mxu2 %v83_v4  ;;  %v80_v7 = vld [vmem:[%s1815_s1 + $0x8] sm:$0xff]  ;;  %v79_v8 = vld [vmem:[%s1815_s1] sm:$0xff]  ;;  %v17_v17 = vld [vmem:[%s1814_s0 + $0x10] sm:$0xff]  ;;  %vm706_vm2 = vcmask 31760   ;;  %vm847_vm3 = vcmask 1041409   ;;  %s864_s22 = sshll.u32 %s1817_s3, 4  ;;  %s865_s22 = int_to_ptr.hbm [resolvable:$true] %s864_s22 }
   0xb   :  { %949 = vmatpush.msra.mxu1 %v83_v4  ;;  %951 = vmatpush.msra.mxu3 %v83_v4  ;;  %v15_v9 = vld [vmem:[%s1814_s0] sm:$0xff]  ;;  %v16_v13 = vld [vmem:[%s1814_s0 + $0x8] sm:$0xff]  ;;  %v49_v18 = vld [vmem:[%s1814_s0 + $0x110] sm:$0xff]  ;;  %vm855_vm5 = vcmask 25600  }
   0xc   :  { %297 = vmatpush.msra.mxu0 %v82_v5  ;;  %953 = vmatpush.msra.mxu2 %v82_v5  ;;  %v47_v10 = vld [vmem:[%s1814_s0 + $0x100] sm:$0xff]  ;;  %v48_v14 = vld [vmem:[%s1814_s0 + $0x108] sm:$0xff]  ;;  %v33_v19 = vld [vmem:[%s1814_s0 + $0x90] sm:$0xff] }
   0xd   :  { %952 = vmatpush.msra.mxu1 %v82_v5  ;;  %954 = vmatpush.msra.mxu3 %v82_v5  ;;  %v31_v11 = vld [vmem:[%s1814_s0 + $0x80] sm:$0xff]  ;;  %v32_v15 = vld [vmem:[%s1814_s0 + $0x88] sm:$0xff]  ;;  %v65_v20 = vld [vmem:[%s1814_s0 + $0x190] sm:$0xff] }
   0xe   :  { %298 = vmatpush.msra.mxu0 %v81_v6  ;;  %956 = vmatpush.msra.mxu2 %v81_v6  ;;  %v63_v12 = vld [vmem:[%s1814_s0 + $0x180] sm:$0xff]  ;;  %v64_v16 = vld [vmem:[%s1814_s0 + $0x188] sm:$0xff]  ;;  %v18_v21 = vld [vmem:[%s1814_s0 + $0x18] sm:$0xff] }
   0xf   :  { %955 = vmatpush.msra.mxu1 %v81_v6  ;;  %957 = vmatpush.msra.mxu3 %v81_v6  ;;  %v50_v22 = vld [vmem:[%s1814_s0 + $0x118] sm:$0xff]  ;;  %v19_v25 = vld [vmem:[%s1814_s0 + $0x20] sm:$0xff]  ;;  %v20_v29 = vld [vmem:[%s1814_s0 + $0x28] sm:$0xff] }
  0x10   :  { %299 = vmatpush.msra.mxu0 %v80_v7  ;;  %959 = vmatpush.msra.mxu2 %v80_v7  ;;  %v34_v23 = vld [vmem:[%s1814_s0 + $0x98] sm:$0xff]  ;;  %v51_v26 = vld [vmem:[%s1814_s0 + $0x120] sm:$0xff]  ;;  %v52_v30 = vld [vmem:[%s1814_s0 + $0x128] sm:$0xff] }
  0x11   :  { %958 = vmatpush.msra.mxu1 %v80_v7  ;;  %960 = vmatpush.msra.mxu3 %v80_v7  ;;  %v66_v24 = vld [vmem:[%s1814_s0 + $0x198] sm:$0xff]  ;;  %v35_v27 = vld [vmem:[%s1814_s0 + $0xa0] sm:$0xff]  ;;  %v36_v31 = vld [vmem:[%s1814_s0 + $0xa8] sm:$0xff] }
  0x12   :  { %300 = vmatpush.msra.mxu0 %v79_v8  ;;  %962 = vmatpush.msra.mxu2 %v79_v8  ;;  %v67_v28 = vld [vmem:[%s1814_s0 + $0x1a0] sm:$0xff]  ;;  %v68_v32 = vld [vmem:[%s1814_s0 + $0x1a8] sm:$0xff]  ;;  %v21_v33 = vld [vmem:[%s1814_s0 + $0x30] sm:$0xff] }
  0x13   :  { %873 = vmatmul.msk.f32.vlgmr.msra.gmra.mxu0 %vm92_vm0, %v15_v9  ;;  %905 = vmatmul.msk.f32.vlgmr.msra.gmra.mxu2 %vm92_vm0, %v47_v10  ;;  %v53_v34 = vld [vmem:[%s1814_s0 + $0x130] sm:$0xff]  ;;  %v22_v37 = vld [vmem:[%s1814_s0 + $0x38] sm:$0xff]  ;;  %v23_v41 = vld [vmem:[%s1814_s0 + $0x40] sm:$0xff] }
  0x14   :  { %961 = vmatpush.msra.mxu1 %v79_v8  ;;  %963 = vmatpush.msra.mxu3 %v79_v8  ;;  %v37_v35 = vld [vmem:[%s1814_s0 + $0xb0] sm:$0xff]  ;;  %v54_v38 = vld [vmem:[%s1814_s0 + $0x138] sm:$0xff]  ;;  %v55_v42 = vld [vmem:[%s1814_s0 + $0x140] sm:$0xff] }
  0x15   :  { %889 = vmatmul.msk.f32.vlgmr.msra.gmra.mxu1 %vm92_vm0, %v31_v11  ;;  %921 = vmatmul.msk.f32.vlgmr.msra.gmra.mxu3 %vm92_vm0, %v63_v12  ;;  %v69_v36 = vld [vmem:[%s1814_s0 + $0x1b0] sm:$0xff]  ;;  %v38_v39 = vld [vmem:[%s1814_s0 + $0xb8] sm:$0xff]  ;;  %v39_v43 = vld [vmem:[%s1814_s0 + $0xc0] sm:$0xff] }
  0x16   :  { %v70_v40 = vld [vmem:[%s1814_s0 + $0x1b8] sm:$0xff]  ;;  %v71_v44 = vld [vmem:[%s1814_s0 + $0x1c0] sm:$0xff]  ;;  %v24_v45 = vld [vmem:[%s1814_s0 + $0x48] sm:$0xff] }
  0x17   :  { %v56_v46 = vld [vmem:[%s1814_s0 + $0x148] sm:$0xff]  ;;  %v25_v49 = vld [vmem:[%s1814_s0 + $0x50] sm:$0xff]  ;;  %v26_v53 = vld [vmem:[%s1814_s0 + $0x58] sm:$0xff] }
  0x18   :  { %v40_v47 = vld [vmem:[%s1814_s0 + $0xc8] sm:$0xff]  ;;  %v57_v50 = vld [vmem:[%s1814_s0 + $0x150] sm:$0xff]  ;;  %v58_v54 = vld [vmem:[%s1814_s0 + $0x158] sm:$0xff] }
  0x19   :  { %v72_v48 = vld [vmem:[%s1814_s0 + $0x1c8] sm:$0xff]  ;;  %v41_v51 = vld [vmem:[%s1814_s0 + $0xd0] sm:$0xff]  ;;  %v42_v55 = vld [vmem:[%s1814_s0 + $0xd8] sm:$0xff] }
  0x1a   :  { %v73_v52 = vld [vmem:[%s1814_s0 + $0x1d0] sm:$0xff]  ;;  %v74_v56 = vld [vmem:[%s1814_s0 + $0x1d8] sm:$0xff]  ;;  %v27_v57 = vld [vmem:[%s1814_s0 + $0x60] sm:$0xff] }
  0x1b   :  { %874 = vmatmul.msk.f32.gmra.mxu0 %vm92_vm0, %v16_v13  ;;  %906 = vmatmul.msk.f32.gmra.mxu2 %vm92_vm0, %v48_v14  ;;  %v59_v58 = vld [vmem:[%s1814_s0 + $0x160] sm:$0xff]  ;;  %v28_v61 = vld [vmem:[%s1814_s0 + $0x68] sm:$0xff]  ;;  %v29_v1 = vld [vmem:[%s1814_s0 + $0x70] sm:$0xff] }
  0x1c   :  { %v43_v59 = vld [vmem:[%s1814_s0 + $0xe0] sm:$0xff]  ;;  %v60_v62 = vld [vmem:[%s1814_s0 + $0x168] sm:$0xff]  ;;  %v61_v2 = vld [vmem:[%s1814_s0 + $0x170] sm:$0xff] }
  0x1d   :  { %890 = vmatmul.msk.f32.gmra.mxu1 %vm92_vm0, %v32_v15  ;;  %922 = vmatmul.msk.f32.gmra.mxu3 %vm92_vm0, %v64_v16  ;;  %v75_v60 = vld [vmem:[%s1814_s0 + $0x1e0] sm:$0xff]  ;;  %v44_v63 = vld [vmem:[%s1814_s0 + $0xe8] sm:$0xff]  ;;  %v45_v3 = vld [vmem:[%s1814_s0 + $0xf0] sm:$0xff] }
  0x1e   :  { %v76_v0 = vld [vmem:[%s1814_s0 + $0x1e8] sm:$0xff]  ;;  %v77_v4 = vld [vmem:[%s1814_s0 + $0x1f0] sm:$0xff]  ;;  %v30_v5 = vld [vmem:[%s1814_s0 + $0x78] sm:$0xff] }
  0x1f   :  { %v62_v6 = vld [vmem:[%s1814_s0 + $0x178] sm:$0xff]  ;;  %v1303_v10 = vld [vmem:[%s1816_s2] ss:$0 sm:$0xff] }
  0x20   :  { %v46_v7 = vld [vmem:[%s1814_s0 + $0xf8] sm:$0xff] }
  0x21   :  { %v78_v8 = vld [vmem:[%s1814_s0 + $0x1f8] sm:$0xff]  ;;  %s996_s0 = smov [#allocation2]  }
  0x22   :  { %s862_s2 = sshll.u32 %s996_s0, 4  ;;  %s863_s2 = int_to_ptr.vmem [resolvable:$true] %s862_s2 }
  0x23   :  { %875 = vmatmul.msk.f32.gmra.mxu0 %vm92_vm0, %v17_v17  ;;  %907 = vmatmul.msk.f32.gmra.mxu2 %vm92_vm0, %v49_v18 }
  0x25   :  { %891 = vmatmul.msk.f32.gmra.mxu1 %vm92_vm0, %v33_v19  ;;  %923 = vmatmul.msk.f32.gmra.mxu3 %vm92_vm0, %v65_v20 }
  0x2b   :  { %876 = vmatmul.msk.f32.gmra.mxu0 %vm92_vm0, %v18_v21  ;;  %908 = vmatmul.msk.f32.gmra.mxu2 %vm92_vm0, %v50_v22 }
  0x2d   :  { %892 = vmatmul.msk.f32.gmra.mxu1 %vm92_vm0, %v34_v23  ;;  %924 = vmatmul.msk.f32.gmra.mxu3 %vm92_vm0, %v66_v24 }
  0x33   :  { %877 = vmatmul.msk.f32.gmra.mxu0 %vm92_vm0, %v19_v25  ;;  %909 = vmatmul.msk.f32.gmra.mxu2 %vm92_vm0, %v51_v26 }
  0x35   :  { %893 = vmatmul.msk.f32.gmra.mxu1 %vm92_vm0, %v35_v27  ;;  %925 = vmatmul.msk.f32.gmra.mxu3 %vm92_vm0, %v67_v28 }
  0x3b   :  { %878 = vmatmul.msk.f32.gmra.mxu0 %vm92_vm0, %v20_v29  ;;  %910 = vmatmul.msk.f32.gmra.mxu2 %vm92_vm0, %v52_v30 }
  0x3d   :  { %894 = vmatmul.msk.f32.gmra.mxu1 %vm92_vm0, %v36_v31  ;;  %926 = vmatmul.msk.f32.gmra.mxu3 %vm92_vm0, %v68_v32 }
  0x43   :  { %879 = vmatmul.msk.f32.gmra.mxu0 %vm92_vm0, %v21_v33  ;;  %911 = vmatmul.msk.f32.gmra.mxu2 %vm92_vm0, %v53_v34 }
  0x45   :  { %895 = vmatmul.msk.f32.gmra.mxu1 %vm92_vm0, %v37_v35  ;;  %927 = vmatmul.msk.f32.gmra.mxu3 %vm92_vm0, %v69_v36 }
  0x4b   :  { %880 = vmatmul.msk.f32.gmra.mxu0 %vm92_vm0, %v22_v37  ;;  %912 = vmatmul.msk.f32.gmra.mxu2 %vm92_vm0, %v54_v38 }
  0x4d   :  { %896 = vmatmul.msk.f32.gmra.mxu1 %vm92_vm0, %v38_v39  ;;  %928 = vmatmul.msk.f32.gmra.mxu3 %vm92_vm0, %v70_v40 }
  0x53   :  { %881 = vmatmul.msk.f32.gmra.mxu0 %vm92_vm0, %v23_v41  ;;  %913 = vmatmul.msk.f32.gmra.mxu2 %vm92_vm0, %v55_v42 }
  0x55   :  { %897 = vmatmul.msk.f32.gmra.mxu1 %vm92_vm0, %v39_v43  ;;  %929 = vmatmul.msk.f32.gmra.mxu3 %vm92_vm0, %v71_v44 }
  0x5b   :  { %882 = vmatmul.msk.f32.gmra.mxu0 %vm92_vm0, %v24_v45  ;;  %914 = vmatmul.msk.f32.gmra.mxu2 %vm92_vm0, %v56_v46 }
  0x5d   :  { %898 = vmatmul.msk.f32.gmra.mxu1 %vm92_vm0, %v40_v47  ;;  %930 = vmatmul.msk.f32.gmra.mxu3 %vm92_vm0, %v72_v48 }
  0x63   :  { %883 = vmatmul.msk.f32.gmra.mxu0 %vm92_vm0, %v25_v49  ;;  %915 = vmatmul.msk.f32.gmra.mxu2 %vm92_vm0, %v57_v50 }
  0x65   :  { %899 = vmatmul.msk.f32.gmra.mxu1 %vm92_vm0, %v41_v51  ;;  %931 = vmatmul.msk.f32.gmra.mxu3 %vm92_vm0, %v73_v52 }
  0x6b   :  { %884 = vmatmul.msk.f32.gmra.mxu0 %vm92_vm0, %v26_v53  ;;  %916 = vmatmul.msk.f32.gmra.mxu2 %vm92_vm0, %v58_v54 }
  0x6d   :  { %900 = vmatmul.msk.f32.gmra.mxu1 %vm92_vm0, %v42_v55  ;;  %932 = vmatmul.msk.f32.gmra.mxu3 %vm92_vm0, %v74_v56 }
  0x73   :  { %885 = vmatmul.msk.f32.gmra.mxu0 %vm92_vm0, %v27_v57  ;;  %917 = vmatmul.msk.f32.gmra.mxu2 %vm92_vm0, %v59_v58 }
  0x75   :  { %901 = vmatmul.msk.f32.gmra.mxu1 %vm92_vm0, %v43_v59  ;;  %933 = vmatmul.msk.f32.gmra.mxu3 %vm92_vm0, %v75_v60 }
  0x7b   :  { %886 = vmatmul.msk.f32.gmra.mxu0 %vm92_vm0, %v28_v61  ;;  %918 = vmatmul.msk.f32.gmra.mxu2 %vm92_vm0, %v60_v62 }
  0x7d   :  { %902 = vmatmul.msk.f32.gmra.mxu1 %vm92_vm0, %v44_v63  ;;  %934 = vmatmul.msk.f32.gmra.mxu3 %vm92_vm0, %v76_v0 }
  0x83   :  { %887 = vmatmul.msk.f32.gmra.mxu0 %vm92_vm0, %v29_v1  ;;  %919 = vmatmul.msk.f32.gmra.mxu2 %vm92_vm0, %v61_v2 }
  0x85   :  { %903 = vmatmul.msk.f32.gmra.mxu1 %vm92_vm0, %v45_v3  ;;  %935 = vmatmul.msk.f32.gmra.mxu3 %vm92_vm0, %v77_v4 }
  0x8b   :  { %888 = vmatmul.msk.f32.gmra.mxu0 %vm92_vm0, %v30_v5  ;;  %920 = vmatmul.msk.f32.gmra.mxu2 %vm92_vm0, %v62_v6 }
  0x8d   :  { %904 = vmatmul.msk.f32.gmra.mxu1 %vm92_vm0, %v46_v7  ;;  %936 = vmatmul.msk.f32.gmra.mxu3 %vm92_vm0, %v78_v8 }
  0x90   :  { %v302_v9 = vpop.f32.mrf.mxu0 }
  0x91   :  { %v303_v12 = vadd.f32 %v1303_v10, %v302_v9 }
  0x92   :  { %v350_v11 = vpop.f32.mrf.mxu1 }
  0x93   :  { %v1307_v14 = vadd.f32 %v1303_v10, %v350_v11  ;;  %v494_v17 = vmax.f32 %v303_v12, 0.0 }
  0x95   :  { %v510_v20 = vmax.f32 %v1307_v14, 0.0  ;;  %v559_v25 = vsel %vm558_vm1, %v494_v17, 0.0  ;;  %v707_v49 = vsel %vm706_vm2, %v494_v17, -inf }
  0x96   :  { %v398_v13 = vpop.f32.mrf.mxu2 }
  0x97   :  { %v399_v19 = vadd.f32 %v1303_v10, %v398_v13  ;;  %v737_v30 = vsel %vm706_vm2, %v510_v20, -inf }
  0x98   :  { %v305_v15 = vpop.f32.mrf.mxu0  ;;  %v446_v16 = vpop.f32.mrf.mxu3 }
  0x99   :  { %v306_v18 = vadd.f32 %v1303_v10, %v305_v15  ;;  %v1313_v23 = vadd.f32 %v1303_v10, %v446_v16  ;;  %v526_v27 = vmax.f32 %v399_v19, 0.0 }
  0x9a   :  { %v353_v21 = vpop.f32.mrf.mxu1 }
  0x9b   :  { %v495_v22 = vmax.f32 %v306_v18, 0.0  ;;  %v1316_v24 = vadd.f32 %v1303_v10, %v353_v21  ;;  %v542_v33 = vmax.f32 %v1313_v23, 0.0  ;;  %v628_v41 = vsel %vm558_vm1, %v526_v27, 0.0 }
  0x9c   :  { %v776_v2 = vsel %vm706_vm2, %v526_v27, -inf }
  0x9d   :  { %v560_v26 = vsel %vm558_vm1, %v495_v22, 0.0  ;;  %v511_v31 = vmax.f32 %v1316_v24, 0.0  ;;  %v806_v45 = vsel %vm706_vm2, %v542_v33, -inf  ;;  %v1367_v12 = vsel %vm706_vm2, %v495_v22, -inf }
  0x9e   :  { %v561_v28 = vadd.f32 %v560_v26, %v559_v25  ;;  %v401_v29 = vpop.f32.mrf.mxu2 }
  0x9f   :  { %v402_v32 = vadd.f32 %v1303_v10, %v401_v29  ;;  %v739_v35 = vsel %vm706_vm2, %v511_v31, -inf }
  0xa0   :  { %v308_v34 = vpop.f32.mrf.mxu0  ;;  %v449_v36 = vpop.f32.mrf.mxu3  ;;  %v738_v39 = vmax.f32 %v739_v35, %v737_v30 }
  0xa1   :  { %v527_v37 = vmax.f32 %v402_v32, 0.0  ;;  %v309_v38 = vadd.f32 %v1303_v10, %v308_v34  ;;  %v1331_v40 = vadd.f32 %v1303_v10, %v449_v36 }
  0xa2   :  { %v356_v42 = vpop.f32.mrf.mxu1 }
  0xa3   :  { %v629_v43 = vsel %vm558_vm1, %v527_v37, 0.0  ;;  %v496_v44 = vmax.f32 %v309_v38, 0.0  ;;  %v1823_v46 = vmax.f32 %v1331_v40, 0.0  ;;  %v1340_v48 = vadd.f32 %v1303_v10, %v356_v42 }
  0xa4   :  { %v630_v47 = vadd.f32 %v629_v43, %v628_v41  ;;  %v1394_v35 = vsel %vm706_vm2, %v527_v37, -inf }
  0xa5   :  { %v562_v50 = vsel %vm558_vm1, %v496_v44, 0.0  ;;  %v709_v51 = vsel %vm706_vm2, %v496_v44, -inf  ;;  %v808_v52 = vsel %vm706_vm2, %v1823_v46, -inf  ;;  %v512_v57 = vmax.f32 %v1340_v48, 0.0 }
  0xa6   :  { %v563_v53 = vadd.f32 %v562_v50, %v561_v28  ;;  %v710_v54 = vmax.f32 %v707_v49, %v709_v51  ;;  %v404_v55 = vpop.f32.mrf.mxu2  ;;  %v807_v56 = vmax.f32 %v808_v52, %v806_v45 }
  0xa7   :  { %v405_v58 = vadd.f32 %v1303_v10, %v404_v55  ;;  %v741_v60 = vsel %vm706_vm2, %v512_v57, -inf }
  0xa8   :  { %v311_v59 = vpop.f32.mrf.mxu0  ;;  %v452_v61 = vpop.f32.mrf.mxu3  ;;  %v1354_v0 = vmax.f32 %v738_v39, %v741_v60 }
  0xa9   :  { %v528_v62 = vmax.f32 %v405_v58, 0.0  ;;  %v312_v63 = vadd.f32 %v1303_v10, %v311_v59  ;;  %v1357_v1 = vadd.f32 %v1303_v10, %v452_v61 }
  0xaa   :  { %v359_v3 = vpop.f32.mrf.mxu1 }
  0xab   :  { %v631_v4 = vsel %vm558_vm1, %v528_v62, 0.0  ;;  %v778_v5 = vsel %vm706_vm2, %v528_v62, -inf  ;;  %v497_v6 = vmax.f32 %v312_v63, 0.0  ;;  %v1821_v7 = vmax.f32 %v1357_v1, 0.0 }
  0xac   :  { %v632_v8 = vadd.f32 %v631_v4, %v630_v47  ;;  %v779_v9 = vmax.f32 %v776_v2, %v778_v5  ;;  %v1364_v11 = vadd.f32 %v1303_v10, %v359_v3 }
  0xad   :  { %v564_v13 = vsel %vm558_vm1, %v497_v6, 0.0  ;;  %v1371_v15 = vsel %vm706_vm2, %v497_v6, -inf  ;;  %v810_v16 = vsel %vm706_vm2, %v1821_v7, -inf }
  0xae   :  { %v565_v17 = vadd.f32 %v564_v13, %v563_v53  ;;  %v712_v18 = vmax.f32 %v1367_v12, %v1371_v15  ;;  %v407_v19 = vpop.f32.mrf.mxu2  ;;  %v1378_v21 = vmax.f32 %v807_v56, %v810_v16  ;;  %v1824_v25 = vmax.f32 %v1364_v11, 0.0 }
  0xaf   :  { %v408_v22 = vadd.f32 %v1303_v10, %v407_v19 }
  0xb0   :  { %v314_v26 = vpop.f32.mrf.mxu0  ;;  %v1385_v27 = vsel %vm706_vm2, %v1824_v25, -inf  ;;  %v455_v28 = vpop.f32.mrf.mxu3 }
  0xb1   :  { %v529_v29 = vmax.f32 %v408_v22, 0.0  ;;  %v315_v30 = vadd.f32 %v1303_v10, %v314_v26  ;;  %v746_v32 = vmax.f32 %v1354_v0, %v1385_v27  ;;  %v1391_v34 = vadd.f32 %v1303_v10, %v455_v28 }
  0xb2   :  { %v362_v36 = vpop.f32.mrf.mxu1 }
  0xb3   :  { %v633_v38 = vsel %vm558_vm1, %v529_v29, 0.0  ;;  %v1398_v39 = vsel %vm706_vm2, %v529_v29, -inf  ;;  %v498_v41 = vmax.f32 %v315_v30, 0.0  ;;  %v1818_v42 = vmax.f32 %v1391_v34, 0.0 }
  0xb4   :  { %v634_v43 = vadd.f32 %v633_v38, %v632_v8  ;;  %v781_v44 = vmax.f32 %v1394_v35, %v1398_v39  ;;  %v1420_v22 = vadd.f32 %v1303_v10, %v362_v36 }
  0xb5   :  { %v566_v45 = vsel %vm558_vm1, %v498_v41, 0.0  ;;  %v713_v47 = vsel %vm706_vm2, %v498_v41, -inf  ;;  %v1408_v37 = vsel %vm706_vm2, %v1818_v42, -inf }
  0xb6   :  { %v567_v49 = vadd.f32 %v566_v45, %v565_v17  ;;  %v1410_v50 = vmax.f32 %v710_v54, %v713_v47  ;;  %v410_v51 = vpop.f32.mrf.mxu2  ;;  %v815_v52 = vmax.f32 %v1378_v21, %v1408_v37  ;;  %v1839_v23 = vmax.f32 %v1420_v22, 0.0 }
  0xb7   :  { %v411_v53 = vadd.f32 %v1303_v10, %v410_v51 }
  0xb8   :  { %v317_v55 = vpop.f32.mrf.mxu0  ;;  %v458_v56 = vpop.f32.mrf.mxu3 }
  0xb9   :  { %v530_v58 = vmax.f32 %v411_v53, 0.0  ;;  %v318_v26 = vadd.f32 %v1303_v10, %v317_v55  ;;  %v1427_v28 = vadd.f32 %v1303_v10, %v458_v56 }
  0xba   :  { %v365_v59 = vpop.f32.mrf.mxu1 }
  0xbb   :  { %v635_v60 = vsel %vm558_vm1, %v530_v58, 0.0  ;;  %v782_v61 = vsel %vm706_vm2, %v530_v58, -inf  ;;  %v1430_v29 = vadd.f32 %v1303_v10, %v365_v59  ;;  %v499_v41 = vmax.f32 %v318_v26, 0.0 }
  0xbc   :  { %v636_v62 = vadd.f32 %v635_v60, %v634_v43  ;;  %v1417_v63 = vmax.f32 %v779_v9, %v782_v61  ;;  %v1822_v9 = vmax.f32 %v1420_v22, 0.0  ;;  %v1819_v51 = vmax.f32 %v1427_v28, 0.0 }
  0xbd   :  { %v1820_v53 = vmax.f32 %v1430_v29, 0.0  ;;  %v568_v55 = vsel %vm558_vm1, %v499_v41, 0.0  ;;  %v1463_v26 = vsel %vm558_vm1, %v511_v31, 0.0 }
  0xbe   :  { %v413_v0 = vpop.f32.mrf.mxu2  ;;  %v745_v47 = vsel %vm706_vm2, %v1822_v9, -inf }
  0xbf   :  { %v414_v36 = vadd.f32 %v1303_v10, %v413_v0  ;;  %v747_v14 = vsel %vm706_vm2, %v1820_v53, -inf }
  0xc0   :  { %v320_v54 = vpop.f32.mrf.mxu0  ;;  %v461_v2 = vpop.f32.mrf.mxu3 }
  0xc1   :  { %v321_v43 = vadd.f32 %v1303_v10, %v320_v54  ;;  %v531_v56 = vmax.f32 %v414_v36, 0.0  ;;  %v1447_v58 = vadd.f32 %v1303_v10, %v461_v2  ;;  %v1458_v54 = vsel %vm558_vm1, %v510_v20, 0.0 }
  0xc2   :  { %v368_v3 = vpop.f32.mrf.mxu1  ;;  %v750_v2 = vmax.f32 %v746_v32, %v745_v47 }
  0xc3   :  { %v1450_v59 = vadd.f32 %v1303_v10, %v368_v3  ;;  %v500_v60 = vmax.f32 %v321_v43, 0.0  ;;  %v569_v3 = vadd.f32 %v568_v55, %v567_v49  ;;  %v715_v43 = vsel %vm706_vm2, %v499_v41, -inf }
  0xc4   :  { %v637_v24 = vsel %vm558_vm1, %v531_v56, 0.0  ;;  %v784_v31 = vsel %vm706_vm2, %v531_v56, -inf  ;;  %v1828_v32 = vmax.f32 %v1447_v58, 0.0  ;;  %v1491_v53 = vmax.f32 %v712_v18, %v715_v43 }
  0xc5   :  { %v516_v49 = vmax.f32 %v1450_v59, 0.0  ;;  %v638_v9 = vadd.f32 %v637_v24, %v636_v62  ;;  %v717_v12 = vsel %vm706_vm2, %v500_v60, -inf }
  0xc6   :  { %v416_v4 = vpop.f32.mrf.mxu2  ;;  %v816_v15 = vsel %vm706_vm2, %v1828_v32, -inf }
  0xc7   :  { %v417_v61 = vadd.f32 %v1303_v10, %v416_v4  ;;  %v814_v4 = vsel %vm706_vm2, %v1819_v51, -inf  ;;  %v749_v18 = vsel %vm706_vm2, %v516_v49, -inf }
  0xc8   :  { %v323_v5 = vpop.f32.mrf.mxu0  ;;  %v464_v6 = vpop.f32.mrf.mxu3  ;;  %v819_v56 = vmax.f32 %v815_v52, %v814_v4 }
  0xc9   :  { %v324_v36 = vadd.f32 %v1303_v10, %v323_v5  ;;  %v570_v5 = vsel %vm558_vm1, %v500_v60, 0.0  ;;  %v532_v41 = vmax.f32 %v417_v61, 0.0  ;;  %v1481_v47 = vadd.f32 %v1303_v10, %v464_v6 }
  0xca   :  { %v371_v8 = vpop.f32.mrf.mxu1  ;;  %v1500_v6 = vmax.f32 %v781_v44, %v784_v31  ;;  %v571_v25 = vadd.f32 %v570_v5, %v569_v3  ;;  %v718_v60 = vmax.f32 %v1410_v50, %v717_v12 }
  0xcb   :  { %v1484_v55 = vadd.f32 %v1303_v10, %v371_v8  ;;  %v501_v7 = vmax.f32 %v324_v36, 0.0  ;;  %v754_v8 = vmax.f32 %v750_v2, %v747_v14  ;;  %v639_v21 = vsel %vm558_vm1, %v532_v41, 0.0 }
  0xcc   :  { %v786_v35 = vsel %vm706_vm2, %v532_v41, -inf  ;;  %v1825_v39 = vmax.f32 %v1481_v47, 0.0  ;;  %v823_v2 = vmax.f32 %v819_v56, %v816_v15  ;;  %v640_v14 = vadd.f32 %v639_v21, %v638_v9 }
  0xcd   :  { %v1831_v44 = vmax.f32 %v1484_v55, 0.0  ;;  %v572_v52 = vsel %vm558_vm1, %v501_v7, 0.0  ;;  %v787_v24 = vmax.f32 %v1417_v63, %v786_v35  ;;  %v758_v31 = vmax.f32 %v754_v8, %v749_v18 }
  0xce   :  { %v419_v13 = vpop.f32.mrf.mxu2  ;;  %v573_v5 = vadd.f32 %v572_v52, %v571_v25  ;;  %v818_v50 = vsel %vm706_vm2, %v1825_v39, -inf }
  0xcf   :  { %v420_v61 = vadd.f32 %v1303_v10, %v419_v13  ;;  %v827_v12 = vmax.f32 %v823_v2, %v818_v50 }
  0xd0   :  { %v326_v16 = vpop.f32.mrf.mxu0  ;;  %v467_v17 = vpop.f32.mrf.mxu3 }
  0xd1   :  { %v327_v46 = vadd.f32 %v1303_v10, %v326_v16  ;;  %v533_v62 = vmax.f32 %v420_v61, 0.0  ;;  %v1516_v13 = vadd.f32 %v1303_v10, %v467_v17 }
  0xd2   :  { %v374_v19 = vpop.f32.mrf.mxu1 }
  0xd3   :  { %v1519_v16 = vadd.f32 %v1303_v10, %v374_v19  ;;  %v502_v36 = vmax.f32 %v327_v46, 0.0  ;;  %v719_v19 = vsel %vm706_vm2, %v501_v7, -inf  ;;  %v751_v46 = vsel %vm706_vm2, %v1831_v44, -inf }
  0xd4   :  { %v641_v9 = vsel %vm558_vm1, %v533_v62, 0.0  ;;  %v788_v63 = vsel %vm706_vm2, %v533_v62, -inf  ;;  %v1826_v41 = vmax.f32 %v1516_v13, 0.0  ;;  %v720_v8 = vmax.f32 %v1491_v53, %v719_v19 }
  0xd5   :  { %v1827_v25 = vmax.f32 %v1519_v16, 0.0  ;;  %v574_v7 = vsel %vm558_vm1, %v502_v36, 0.0  ;;  %v642_v21 = vadd.f32 %v641_v9, %v640_v14  ;;  %v789_v35 = vmax.f32 %v1500_v6, %v788_v63 }
  0xd6   :  { %v1423_v27 = vpop.f32.mrf.mxu2  ;;  %v762_v52 = vmax.f32 %v758_v31, %v751_v46  ;;  %v721_v39 = vsel %vm706_vm2, %v502_v36, -inf }
  0xd7   :  { %v423_v3 = vadd.f32 %v1303_v10, %v1423_v27  ;;  %v753_v53 = vsel %vm706_vm2, %v1827_v25, -inf  ;;  %v1573_v50 = vmax.f32 %v718_v60, %v721_v39 }
  0xd8   :  { %v1432_v30 = vpop.f32.mrf.mxu0  ;;  %v1434_v38 = vpop.f32.mrf.mxu3  ;;  %v736_v25 = vmax.f32 %v753_v53, %v762_v52 }
  0xd9   :  { %v330_v17 = vadd.f32 %v1303_v10, %v1432_v30  ;;  %v534_v30 = vmax.f32 %v423_v3, 0.0  ;;  %v1543_v56 = vadd.f32 %v1303_v10, %v1434_v38  ;;  %v575_v38 = vadd.f32 %v574_v7, %v573_v5 }
  0xda   :  { %v1438_v45 = vpop.f32.mrf.mxu1 }
  0xdb   :  { %v1547_v61 = vadd.f32 %v1303_v10, %v1438_v45  ;;  %v503_v15 = vmax.f32 %v330_v17, 0.0  ;;  %v820_v45 = vsel %vm706_vm2, %v1826_v41, -inf  ;;  %v790_v2 = vsel %vm706_vm2, %v534_v30, -inf }
  0xdc   :  { %v1829_v6 = vmax.f32 %v1543_v56, 0.0  ;;  %v1580_v41 = vmax.f32 %v787_v24, %v790_v2 }
  0xdd   :  { %v576_v36 = vsel %vm558_vm1, %v503_v15, 0.0  ;;  %v723_v32 = vsel %vm706_vm2, %v503_v15, -inf }
  0xde   :  { %v1453_v0 = vpop.f32.mrf.mxu2 }
  0xdf   :  { %v426_v18 = vadd.f32 %v1303_v10, %v1453_v0  ;;  %v643_v0 = vsel %vm558_vm1, %v534_v30, 0.0 }
  0xe0   :  { %v332_v20 = vpop.f32.mrf.mxu0  ;;  %v1473_v42 = vpop.f32.mrf.mxu3  ;;  %v644_v30 = vadd.f32 %v643_v0, %v642_v21 }
  0xe1   :  { %v333_v62 = vadd.f32 %v1303_v10, %v332_v20  ;;  %v1830_v20 = vmax.f32 %v1547_v61, 0.0  ;;  %v535_v17 = vmax.f32 %v426_v18, 0.0  ;;  %v1571_v19 = vadd.f32 %v1303_v10, %v1473_v42 }
  0xe2   :  { %v1486_v51 = vpop.f32.mrf.mxu1  ;;  %v831_v18 = vmax.f32 %v827_v12, %v820_v45  ;;  %v822_v42 = vsel %vm706_vm2, %v1829_v6, -inf }
  0xe3   :  { %v504_v46 = vmax.f32 %v333_v62, 0.0  ;;  %v1578_v63 = vadd.f32 %v1303_v10, %v1486_v51  ;;  %v755_v39 = vsel %vm706_vm2, %v1830_v20, -inf  ;;  %v645_v51 = vsel %vm558_vm1, %v535_v17, 0.0 }
  0xe4   :  { %v1832_v24 = vmax.f32 %v1571_v19, 0.0  ;;  %v805_v45 = vmax.f32 %v822_v42, %v831_v18  ;;  %v740_v53 = vmax.f32 %v736_v25, %v755_v39  ;;  %v646_v2 = vadd.f32 %v645_v51, %v644_v30 }
  0xe5   :  { %v578_v12 = vsel %vm558_vm1, %v504_v46, 0.0  ;;  %v1833_v15 = vmax.f32 %v1578_v63, 0.0 }
  0xe6   :  { %v428_v37 = vpop.f32.mrf.mxu2 }
  0xe7   :  { %v429_v9 = vadd.f32 %v1303_v10, %v428_v37  ;;  %v792_v37 = vsel %vm706_vm2, %v535_v17, -inf  ;;  %v725_v17 = vsel %vm706_vm2, %v504_v46, -inf }
  0xe8   :  { %v335_v43 = vpop.f32.mrf.mxu0  ;;  %v476_v4 = vpop.f32.mrf.mxu3  ;;  %v726_v46 = vmax.f32 %v1573_v50, %v725_v17 }
  0xe9   :  { %v336_v5 = vadd.f32 %v1303_v10, %v335_v43  ;;  %v577_v43 = vadd.f32 %v576_v36, %v575_v38  ;;  %v536_v21 = vmax.f32 %v429_v9, 0.0  ;;  %v1595_v62 = vadd.f32 %v1303_v10, %v476_v4 }
  0xea   :  { %v1534_v27 = vpop.f32.mrf.mxu1  ;;  %v724_v38 = vmax.f32 %v720_v8, %v723_v32  ;;  %v793_v36 = vmax.f32 %v789_v35, %v792_v37  ;;  %v824_v4 = vsel %vm706_vm2, %v1832_v24, -inf  ;;  %v757_v8 = vsel %vm706_vm2, %v1833_v15, -inf }
  0xeb   :  { %v505_v60 = vmax.f32 %v336_v5, 0.0  ;;  %v579_v9 = vadd.f32 %v578_v12, %v577_v43  ;;  %v647_v25 = vsel %vm558_vm1, %v536_v21, 0.0  ;;  %v1834_v35 = vmax.f32 %v1595_v62, 0.0 }
  0xec   :  { %v1616_v30 = vsel %vm706_vm2, %v536_v21, -inf  ;;  %v809_v39 = vmax.f32 %v805_v45, %v824_v4  ;;  %v648_v37 = vadd.f32 %v647_v25, %v646_v2  ;;  %v744_v12 = vmax.f32 %v740_v53, %v757_v8 }
  0xed   :  { %v727_v44 = vsel %vm706_vm2, %v505_v60, -inf  ;;  %v580_v43 = vsel %vm558_vm1, %v505_v60, 0.0  ;;  %v795_v15 = vmax.f32 %v1580_v41, %v1616_v30  ;;  %v826_v50 = vsel %vm706_vm2, %v1834_v35, -inf }
  0xee   :  { %v431_v3 = vpop.f32.mrf.mxu2  ;;  %v728_v42 = vmax.f32 %v724_v38, %v727_v44  ;;  %v581_v44 = vadd.f32 %v580_v43, %v579_v9 }
  0xef   :  { %v432_v0 = vadd.f32 %v1303_v10, %v431_v3  ;;  %v1612_v3 = vadd.f32 %v1303_v10, %v1534_v27 }
  0xf0   :  { %v338_v14 = vpop.f32.mrf.mxu0  ;;  %v1565_v31 = vpop.f32.mrf.mxu3 }
  0xf1   :  { %v339_v5 = vadd.f32 %v1303_v10, %v338_v14  ;;  %v537_v18 = vmax.f32 %v432_v0, 0.0  ;;  %v521_v0 = vmax.f32 %v1612_v3, 0.0 }
  0xf2   :  { %v386_v7 = vpop.f32.mrf.mxu1 }
  0xf3   :  { %v506_v51 = vmax.f32 %v339_v5, 0.0  ;;  %v796_v38 = vsel %vm706_vm2, %v537_v18, -inf  ;;  %v649_v53 = vsel %vm558_vm1, %v537_v18, 0.0  ;;  %v1636_v5 = vadd.f32 %v1303_v10, %v386_v7 }
  0xf4   :  { %v797_v30 = vmax.f32 %v793_v36, %v796_v38  ;;  %v759_v18 = vsel %vm706_vm2, %v521_v0, -inf  ;;  %v650_v7 = vadd.f32 %v649_v53, %v648_v37 }
  0xf5   :  { %v729_v41 = vsel %vm706_vm2, %v506_v51, -inf  ;;  %v522_v36 = vmax.f32 %v1636_v5, 0.0 }
  0xf6   :  { %v434_v52 = vpop.f32.mrf.mxu2 }
  0xf7   :  { %v435_v24 = vadd.f32 %v1303_v10, %v434_v52  ;;  %v1631_v52 = vadd.f32 %v1303_v10, %v1565_v31  ;;  %v813_v31 = vmax.f32 %v809_v39, %v826_v50 }
  0xf8   :  { %v341_v6 = vpop.f32.mrf.mxu0  ;;  %v482_v20 = vpop.f32.mrf.mxu3 }
  0xf9   :  { %v342_v32 = vadd.f32 %v1303_v10, %v341_v6  ;;  %v1640_v8 = vadd.f32 %v1303_v10, %v482_v20  ;;  %v730_v20 = vmax.f32 %v726_v46, %v729_v41 }
  0xfa   :  { %v389_v14 = vpop.f32.mrf.mxu1 }
  0xfb   :  { %v507_v6 = vmax.f32 %v342_v32, 0.0  ;;  %v538_v32 = vmax.f32 %v435_v24, 0.0  ;;  %v1646_v43 = vadd.f32 %v1303_v10, %v389_v14  ;;  %v1836_v24 = vmax.f32 %v1631_v52, 0.0 }
  0xfc   :  { %v1835_v38 = vmax.f32 %v1640_v8, 0.0 }
  0xfd   :  { %v731_v27 = vsel %vm706_vm2, %v507_v6, -inf  ;;  %v651_v39 = vsel %vm558_vm1, %v538_v32, 0.0  ;;  %v584_v50 = vsel %vm558_vm1, %v507_v6, 0.0  ;;  %v798_v46 = vsel %vm706_vm2, %v538_v32, -inf }
  0xfe   :  { %v732_v21 = vmax.f32 %v728_v42, %v731_v27  ;;  %v437_v60 = vpop.f32.mrf.mxu2  ;;  %v828_v6 = vsel %vm706_vm2, %v1836_v24, -inf }
  0xff   :  { %v438_v45 = vadd.f32 %v1303_v10, %v437_v60 }
 0x100   :  { %v748_v2 = vmax.f32 %v744_v12, %v732_v21  ;;  %v344_v17 = vpop.f32.mrf.mxu0  ;;  %v485_v4 = vpop.f32.mrf.mxu3  ;;  %v582_v21 = vsel %vm558_vm1, %v506_v51, 0.0 }
 0x101   :  { %v539_v9 = vmax.f32 %v438_v45, 0.0  ;;  %v345_v25 = vadd.f32 %v1303_v10, %v344_v17  ;;  %v583_v35 = vadd.f32 %v582_v21, %v581_v44 }
 0x102   :  { %v392_v42 = vpop.f32.mrf.mxu1  ;;  %v752_v37 = vmax.f32 %v748_v2, %v759_v18 }
 0x103   :  { %v800_v12 = vsel %vm706_vm2, %v539_v9, -inf  ;;  %v508_v27 = vmax.f32 %v345_v25, 0.0  ;;  %v523_v25 = vmax.f32 %v1646_v43, 0.0  ;;  %v1660_v41 = vadd.f32 %v1303_v10, %v392_v42 }
 0x104   :  { %v801_v60 = vmax.f32 %v797_v30, %v800_v12  ;;  %v652_v12 = vadd.f32 %v651_v39, %v650_v7  ;;  %v585_v32 = vadd.f32 %v584_v50, %v583_v35  ;;  %v799_v42 = vmax.f32 %v795_v15, %v798_v46 }
 0x105   :  { %v733_v14 = vsel %vm706_vm2, %v508_v27, -inf  ;;  %v586_v30 = vsel %vm558_vm1, %v508_v27, 0.0  ;;  %v763_v27 = vsel %vm706_vm2, %v523_v25, -inf  ;;  %v524_v39 = vmax.f32 %v1660_v41, 0.0 }
 0x106   :  { %v817_v45 = vmax.f32 %v813_v31, %v801_v60  ;;  %v734_v53 = vmax.f32 %v730_v20, %v733_v14  ;;  %v440_v17 = vpop.f32.mrf.mxu2  ;;  %v761_v31 = vsel %vm706_vm2, %v522_v36, -inf  ;;  %v830_v60 = vsel %vm706_vm2, %v1835_v38, -inf }
 0x107   :  { %v441_v51 = vadd.f32 %v1303_v10, %v440_v17  ;;  %v1677_v14 = vadd.f32 %v1303_v10, %v485_v4  ;;  %v1855_v43 = vmax.f32 %v1640_v8, 0.0 }
 0x108   :  { %v756_v2 = vmax.f32 %v752_v37, %v734_v53  ;;  %v347_v18 = vpop.f32.mrf.mxu0  ;;  %v488_v44 = vpop.f32.mrf.mxu3  ;;  %v587_v53 = vadd.f32 %v586_v30, %v585_v32  ;;  %v821_v50 = vmax.f32 %v817_v45, %v828_v6 }
 0x109   :  { %v540_v21 = vmax.f32 %v441_v51, 0.0  ;;  %v348_v20 = vadd.f32 %v1303_v10, %v347_v18  ;;  %v653_v51 = vsel %vm558_vm1, %v539_v9, 0.0  ;;  %v1688_v38 = vadd.f32 %v1303_v10, %v488_v44 }
 0x10a   :  { %v395_v37 = vpop.f32.mrf.mxu1  ;;  %v760_v15 = vmax.f32 %v756_v2, %v761_v31  ;;  %v555_v45 = vmax.f32 %v1677_v14, 0.0  ;;  %v765_v9 = vsel %vm706_vm2, %v524_v39, -inf  ;;  %v594_v44 = vsel %vm558_vm1, %v512_v57, 0.0 }
 0x10b   :  { %v802_v7 = vsel %vm706_vm2, %v540_v21, -inf  ;;  %v509_v35 = vmax.f32 %v348_v20, 0.0  ;;  %v1682_v46 = vadd.f32 %v1303_v10, %v395_v37  ;;  %v655_v6 = vsel %vm558_vm1, %v540_v21, 0.0 }
 0x10c   :  { %v803_v17 = vmax.f32 %v799_v42, %v802_v7  ;;  %v654_v42 = vadd.f32 %v653_v51, %v652_v12  ;;  %v556_v21 = vmax.f32 %v1688_v38, 0.0 }
 0x10d   :  { %v588_v18 = vsel %vm558_vm1, %v509_v35, 0.0  ;;  %v735_v4 = vsel %vm706_vm2, %v509_v35, -inf  ;;  %v525_v31 = vmax.f32 %v1682_v46, 0.0 }
 0x10e   :  { %v825_v30 = vmax.f32 %v821_v50, %v803_v17  ;;  %v589_v32 = vadd.f32 %v588_v18, %v587_v53  ;;  %v764_v20 = vmax.f32 %v760_v15, %v735_v4  ;;  %v443_v24 = vpop.f32.mrf.mxu2  ;;  %v656_v15 = vadd.f32 %v655_v6, %v654_v42 }
 0x10f   :  { %v444_v2 = vadd.f32 %v1303_v10, %v443_v24  ;;  %v767_v24 = vsel %vm706_vm2, %v525_v31, -inf  ;;  %v687_v46 = vsel %vm558_vm1, %v556_v21, 0.0 }
 0x110   :  { %v591_v37 = vadd.f32 %v1458_v54, %v589_v32  ;;  %v766_v53 = vmax.f32 %v763_v27, %v764_v20  ;;  %v491_v7 = vpop.f32.mrf.mxu3  ;;  %v829_v17 = vmax.f32 %v825_v30, %v830_v60  ;;  %v832_v27 = vsel %vm706_vm2, %v555_v45, -inf }
 0x111   :  { %v541_v35 = vmax.f32 %v444_v2, 0.0  ;;  %v1706_v50 = vadd.f32 %v1303_v10, %v491_v7  ;;  %v659_v60 = vsel %vm558_vm1, %v542_v33, 0.0  ;;  %v834_v20 = vsel %vm706_vm2, %v556_v21, -inf }
 0x112   :  { %v593_v48 = vadd.f32 %v1463_v26, %v591_v37  ;;  %v768_v57 = vmax.f32 %v765_v9, %v766_v53  ;;  %v1837_v26 = vmax.f32 %v1364_v11, 0.0  ;;  %v598_v33 = vsel %vm558_vm1, %v1839_v23, 0.0 }
 0x113   :  { %v657_v12 = vsel %vm558_vm1, %v541_v35, 0.0  ;;  %v804_v54 = vsel %vm706_vm2, %v541_v35, -inf  ;;  %v557_v51 = vmax.f32 %v1706_v50, 0.0  ;;  %v1847_v23 = vmax.f32 %v1481_v47, 0.0 }
 0x114   :  { %v595_v18 = vadd.f32 %v594_v44, %v593_v48  ;;  %v658_v4 = vadd.f32 %v657_v12, %v656_v15  ;;  %v833_v32 = vmax.f32 %v829_v17, %v804_v54  ;;  %v769_v10 = vmax.f32 %v767_v24, %v768_v57 }
 0x115   :  { %v596_v30 = vsel %vm558_vm1, %v1837_v26, 0.0  ;;  %v1838_v44 = vmax.f32 %v1331_v40, 0.0  ;;  %v836_v11 = vsel %vm706_vm2, %v557_v51, -inf  ;;  %v1840_v15 = vmax.f32 %v1357_v1, 0.0 }
 0x116   :  { %v597_v6 = vadd.f32 %v596_v30, %v595_v18  ;;  %v660_v2 = vadd.f32 %v659_v60, %v658_v4  ;;  %v835_v9 = vmax.f32 %v832_v27, %v833_v32  ;;  %v770_v42 = vrot.slane %v769_v10, 4 }
 0x117   :  { %v661_v37 = vsel %vm558_vm1, %v1838_v44, 0.0  ;;  %v663_v17 = vsel %vm558_vm1, %v1840_v15, 0.0  ;;  %v1841_v40 = vmax.f32 %v1430_v29, 0.0  ;;  %v1842_v27 = vmax.f32 %v1391_v34, 0.0 }
 0x118   :  { %v599_v53 = vadd.f32 %v598_v33, %v597_v6  ;;  %v662_v7 = vadd.f32 %v661_v37, %v660_v2  ;;  %v837_v35 = vmax.f32 %v834_v20, %v835_v9  ;;  %v771_v24 = vmax.f32 %v769_v10, %v770_v42 }
 0x119   :  { %v600_v48 = vsel %vm558_vm1, %v1841_v40, 0.0  ;;  %v665_v18 = vsel %vm558_vm1, %v1842_v27, 0.0  ;;  %v602_v4 = vsel %vm558_vm1, %v516_v49, 0.0  ;;  %v1843_v60 = vmax.f32 %v1427_v28, 0.0 }
 0x11a   :  { %v601_v57 = vadd.f32 %v600_v48, %v599_v53  ;;  %v664_v22 = vadd.f32 %v663_v17, %v662_v7  ;;  %v772_v12 = vrot.slane %v771_v24, 2  ;;  %v838_v54 = vmax.f32 %v836_v11, %v837_v35 }
 0x11b   :  { %v667_v29 = vsel %vm558_vm1, %v1843_v60, 0.0  ;;  %v1844_v26 = vmax.f32 %v1484_v55, 0.0  ;;  %v1845_v9 = vmax.f32 %v1447_v58, 0.0  ;;  %v1846_v49 = vmax.f32 %v1519_v16, 0.0 }
 0x11c   :  { %v603_v32 = vadd.f32 %v602_v4, %v601_v57  ;;  %v666_v1 = vadd.f32 %v665_v18, %v664_v22  ;;  %v839_v10 = vrot.slane %v838_v54, 4  ;;  %v773_v34 = vmax.f32 %v771_v24, %v772_v12 }
 0x11d   :  { %v604_v30 = vsel %vm558_vm1, %v1844_v26, 0.0  ;;  %v669_v59 = vsel %vm558_vm1, %v1845_v9, 0.0  ;;  %v606_v42 = vsel %vm558_vm1, %v1846_v49, 0.0  ;;  %v671_v55 = vsel %vm558_vm1, %v1847_v23, 0.0 }
 0x11e   :  { %v605_v20 = vadd.f32 %v604_v30, %v603_v32  ;;  %v668_v6 = vadd.f32 %v667_v29, %v666_v1  ;;  %v840_v2 = vmax.f32 %v838_v54, %v839_v10  ;;  %v1848_v33 = vmax.f32 %v1547_v61, 0.0 }
 0x11f   :  { %v774_v58 = vrot.slane %v773_v34, 1  ;;  %v1849_v24 = vmax.f32 %v1516_v13, 0.0  ;;  %v1850_v15 = vmax.f32 %v1578_v63, 0.0  ;;  %v1851_v57 = vmax.f32 %v1543_v56, 0.0 }
 0x120   :  { %v607_v44 = vadd.f32 %v606_v42, %v605_v20  ;;  %v670_v28 = vadd.f32 %v669_v59, %v668_v6  ;;  %v841_v37 = vrot.slane %v840_v2, 2  ;;  %v608_v11 = vsel %vm558_vm1, %v1848_v33, 0.0 }
 0x121   :  { %v673_v16 = vsel %vm558_vm1, %v1849_v24, 0.0  ;;  %v610_v17 = vsel %vm558_vm1, %v1850_v15, 0.0  ;;  %v675_v61 = vsel %vm558_vm1, %v1851_v57, 0.0  ;;  %v612_v22 = vsel %vm558_vm1, %v521_v0, 0.0 }
 0x122   :  { %v609_v53 = vadd.f32 %v608_v11, %v607_v44  ;;  %v672_v7 = vadd.f32 %v671_v55, %v670_v28  ;;  %v842_v35 = vmax.f32 %v840_v2, %v841_v37  ;;  %v995_v12 = vmov 256.0  }
 0x123   :  { %967 = vrcp.f32 %v995_v12  ;;  %v775_v27 = vmax.f32 %v773_v34, %v774_v58  ;;  %v1852_v18 = vmax.f32 %v1571_v19, 0.0  ;;  %v614_v56 = vsel %vm558_vm1, %v522_v36, 0.0 }
 0x124   :  { %v611_v40 = vadd.f32 %v610_v17, %v609_v53  ;;  %v674_v47 = vadd.f32 %v673_v16, %v672_v7  ;;  %v843_v48 = vrot.slane %v842_v35, 1  ;;  %v1853_v0 = vmax.f32 %v1595_v62, 0.0 }
 0x125   :  { %v677_v4 = vsel %vm558_vm1, %v1852_v18, 0.0  ;;  %v616_v60 = vsel %vm558_vm1, %v523_v25, 0.0  ;;  %v618_v19 = vsel %vm558_vm1, %v524_v39, 0.0  ;;  %v1854_v36 = vmax.f32 %v1631_v52, 0.0 }
 0x126   :  { %v613_v13 = vadd.f32 %v612_v22, %v611_v40  ;;  %v676_v54 = vadd.f32 %v675_v61, %v674_v47  ;;  %v844_v63 = vmax.f32 %v842_v35, %v843_v48  ;;  %v679_v10 = vsel %vm558_vm1, %v1853_v0, 0.0 }
 0x127   :  { %v681_v30 = vsel %vm558_vm1, %v1854_v36, 0.0  ;;  %v620_v62 = vsel %vm558_vm1, %v525_v31, 0.0  ;;  %v683_v25 = vsel %vm558_vm1, %v1855_v43, 0.0  ;;  %v685_v39 = vsel %vm558_vm1, %v555_v45, 0.0 }
 0x128   :  { %v615_v32 = vadd.f32 %v614_v56, %v613_v13  ;;  %v678_v1 = vadd.f32 %v677_v4, %v676_v54  ;;  %v852_v3 = vsel %vm847_vm3, %v844_v63, %v775_v27  ;;  %v689_v31 = vsel %vm558_vm1, %v557_v51, 0.0 }
 0x129   :  { %v968_v26 = vpop.eup %967 }
 0x12a   :  { %v617_v29 = vadd.f32 %v616_v60, %v615_v32  ;;  %v680_v5 = vadd.f32 %v679_v10, %v678_v1  ;;  %v698_v2 = vmul.f32 256.0, %v968_v26  ;;  %vm702_vm4 = vweird.f32 %v968_v26 }
 0x12c   :  { %v682_v20 = vadd.f32 %v681_v30, %v680_v5  ;;  %v619_v6 = vadd.f32 %v618_v19, %v617_v29  ;;  %v699_v49 = vsub.f32 1.0, %v698_v2 }
 0x12e   :  { %v684_v41 = vadd.f32 %v683_v25, %v682_v20  ;;  %v621_v34 = vadd.f32 %v620_v62, %v619_v6  ;;  %v700_v37 = vmul.f32 %v968_v26, %v699_v49 }
 0x130   :  { %v686_v52 = vadd.f32 %v685_v39, %v684_v41  ;;  %v622_v9 = vrot.slane %v621_v34, 4  ;;  %v701_v33 = vadd.f32 %v968_v26, %v700_v37 }
 0x132   :  { %v688_v8 = vadd.f32 %v687_v46, %v686_v52  ;;  %v623_v59 = vadd.f32 %v622_v9, %v621_v34  ;;  %v703_v53 = vsel %vm702_vm4, %v968_v26, %v701_v33 }
 0x134   :  { %v624_v42 = vrot.slane %v623_v59, 2  ;;  %v690_v44 = vadd.f32 %v689_v31, %v688_v8 }
 0x136   :  { %v625_v28 = vadd.f32 %v624_v42, %v623_v59  ;;  %v691_v14 = vrot.slane %v690_v44, 4 }
 0x138   :  { %v692_v45 = vadd.f32 %v691_v14, %v690_v44  ;;  %v626_v23 = vrot.slane %v625_v28, 1 }
 0x13a   :  { %v693_v55 = vrot.slane %v692_v45, 2  ;;  %v627_v38 = vadd.f32 %v626_v23, %v625_v28 }
 0x13c   :  { %v694_v11 = vadd.f32 %v693_v55, %v692_v45  ;;  %v704_v51 = vmul.f32 %v703_v53, %v627_v38 }
 0x13e   :  { %v695_v21 = vrot.slane %v694_v11, 1 }
 0x140   :  { %v696_v50 = vadd.f32 %v695_v21, %v694_v11 }
 0x142   :  { %v705_v7 = vmul.f32 %v703_v53, %v696_v50 }
 0x144   :  { %v848_v58 = vsel %vm847_vm3, %v705_v7, %v704_v51 }
 0x145   :  { %v854_v35 = vsel %vm558_vm1, %v848_v58, %v852_v3 }
 0x146   :  { %856 = vst.msk [vmem:[#allocation2] sm:$0x3] %vm855_vm5, %v854_v35 }
 0x147   :  { %867 = dma.vmem_to_hbm [thread:$0]  %s863_s2, 32, %s865_s22, [#allocation3]  }
 0x148   :  { %993 = dma.done.wait [#allocation3], 32  }
 0x149   :  { %994 = vsyncadd [#allocation3], 4294967264 }
 0x14a   :  { %872 = vsyncpa [#allocation3], 1 }

</bundles_post_ra>
